<compile_context>
chip_gen: v7x
topology: tpu7x:2x2x1
jax: 0.10.0
libtpu: 0.0.40
codegen_flags: <defaults>
</compile_context>

<pallas_src>
import functools
import numpy as np
import jax
import jax.numpy as jnp
from jax.experimental import pallas as pl
from jax.experimental.pallas import tpu as pltpu


def _round_up(x, m):
    return (x + m - 1) // m * m


def _u32(v):
    return jnp.asarray(v, dtype=jnp.uint32)


# ----------------------------- kernel 1 -------------------------------------
# segment-sum via banded mask matmul (== torch.sparse.mm), divide by length,
# optional GCN linear + ReLU.  Grid = (G row-tiles [parallel], N k-tiles
# [arbitrary/reduction]); per-row-tile k-ranges are scalar-prefetched so
# all-zero tiles are skipped.
def _mean_gcn_kernel(kr_ref, mask_ref, emb_ref, inv_ref, w_ref, b_ref,
                     out_ref, acc_ref, *, use_gcn):
    i = pl.program_id(0)
    k = pl.program_id(1)

    @pl.when(k == 0)
    def _():
        acc_ref[...] = jnp.zeros_like(acc_ref)

    lo = kr_ref[i, 0]
    hi = kr_ref[i, 1]

    @pl.when((k >= lo) & (k <= hi))          # skip all-zero (band) mask tiles
    def _():
        # bf16 x bf16 -> f32 accumulate on the MXU (0/1 mask exact in bf16)
        acc_ref[...] += jnp.dot(mask_ref[...], emb_ref[...],
                                preferred_element_type=jnp.float32)

    @pl.when(k == pl.num_programs(1) - 1)
    def _():
        mean = acc_ref[...] * inv_ref[...]   # embeds_sum / len_s.view(-1,1)
        if use_gcn:
            mean = jnp.dot(mean.astype(jnp.bfloat16), w_ref[...],
                           preferred_element_type=jnp.float32)
            mean = jnp.maximum(mean + b_ref[...], 0.0)   # F.relu(gcn_layer(.))
        out_ref[...] = mean


def compute_k_ranges(len_s, G, G_pad, tg, tn):
    """Per-row-tile inclusive [k_lo, k_hi] column-tile range of the band."""
    len_s = np.asarray(len_s, dtype=np.int64)
    starts = np.zeros(G, dtype=np.int64)
    if G > 1:
        starts[1:] = np.cumsum(len_s[:-1])
    ends = starts + len_s
    n_row_tiles = G_pad // tg
    kr = np.zeros((n_row_tiles, 2), dtype=np.int32)
    for i in range(n_row_tiles):
        r0, r1 = i * tg, min((i + 1) * tg, G)
        if r0 >= G or ends[r1 - 1] <= starts[r0]:
            kr[i] = (1, 0)                       # empty range -> skip everything
        else:
            kr[i] = (starts[r0] // tn, (ends[r1 - 1] - 1) // tn)
    return kr


def mean_aggregate(mask_p, emb_p, inv_p, k_ranges, w_p, b_p, use_gcn, *, tg, tn):
    """mask_p (G_pad, N_pad) bf16, emb_p (N_pad, h_pad) bf16 -> (G_pad, h_pad) f32."""
    G_pad, N_pad = mask_p.shape
    h_pad = emb_p.shape[1]
    assert G_pad % tg == 0 and N_pad % tn == 0
    grid = (G_pad // tg, N_pad // tn)

    def _clamp(k, lo, hi):
        return jnp.minimum(jnp.maximum(k, lo), hi)

    # Out-of-band steps clamp to the previous in-band block index -> the
    # pipeline re-uses the already-resident block (no new DMA).
    def mask_map(i, k, kr):
        return (i, _clamp(k, kr[i, 0], kr[i, 1]))

    def emb_map(i, k, kr):
        return (_clamp(k, kr[i, 0], kr[i, 1]), 0)

    flops = 2 * G_pad * N_pad * h_pad + (2 * G_pad * h_pad * h_pad if use_gcn else 0)
    bytes_accessed = (mask_p.size * 2 + emb_p.size * 2 + inv_p.size * 4 +
                      w_p.size * 2 + b_p.size * 4 + G_pad * h_pad * 4)

    return pl.pallas_call(
        functools.partial(_mean_gcn_kernel, use_gcn=use_gcn),
        out_shape=jax.ShapeDtypeStruct((G_pad, h_pad), jnp.float32),
        grid_spec=pltpu.PrefetchScalarGridSpec(
            num_scalar_prefetch=1,                       # k_ranges -> SMEM
            grid=grid,
            in_specs=[
                pl.BlockSpec((tg, tn), mask_map),                    # mask tile
                pl.BlockSpec((tn, h_pad), emb_map),                  # embeds tile
                pl.BlockSpec((tg, 1), lambda i, k, kr: (i, 0)),      # 1/len_s
                pl.BlockSpec((h_pad, h_pad), lambda i, k, kr: (0, 0)),  # gcn W (bf16)
                pl.BlockSpec((1, h_pad), lambda i, k, kr: (0, 0)),      # gcn b
            ],
            out_specs=pl.BlockSpec((tg, h_pad), lambda i, k, kr: (i, 0)),
            scratch_shapes=[pltpu.VMEM((tg, h_pad), jnp.float32)],
        ),
        compiler_params=pltpu.CompilerParams(
            dimension_semantics=("parallel", "arbitrary"),
            vmem_limit_bytes=64 * 1024 * 1024),
        cost_estimate=pl.CostEstimate(flops=flops, transcendentals=0,
                                      bytes_accessed=bytes_accessed),
    )(k_ranges, mask_p, emb_p, inv_p, w_p, b_p)


# ----------------------------- kernel 2 -------------------------------------
# Per-sequence concat(mean, ent, rel), zero padded timesteps, hash-based
# dropout, one lane-dense 128-lane store per row.  ent/rel are (num_seqs,1,h)
# and DMA'd once per sequence (no jnp.repeat in the wrapper).
def _concat_dropout_kernel(seed_ref, mean_ref, ent_ref, rel_ref, valid_ref,
                           out_ref, *, h_dim, keep_prob):
    mean = mean_ref[...]                                  # (1, T, h)
    ent = jnp.broadcast_to(ent_ref[...], mean.shape)      # (1, 1, h) -> (1, T, h)
    rel = jnp.broadcast_to(rel_ref[...], mean.shape)
    pad = out_ref.shape[-1] - 3 * h_dim
    parts = [mean, ent, rel]
    if pad > 0:
        parts.append(jnp.zeros(mean.shape[:-1] + (pad,), mean.dtype))
    cat = jnp.concatenate(parts, axis=-1)                 # (1, T, 128)
    cat = cat * valid_ref[...]                            # zero padded timesteps
    if keep_prob < 1.0:                                   # training-mode dropout
        # Counter-based hash PRNG (portable; no TPU-only prng primitives).
        s = pl.program_id(0)
        t_idx = jax.lax.broadcasted_iota(jnp.uint32, cat.shape, 1)
        c_idx = jax.lax.broadcasted_iota(jnp.uint32, cat.shape, 2)
        x = (seed_ref[0].astype(jnp.uint32)
             + (s + 1).astype(jnp.uint32) * _u32(0x9E3779B1)   # seed differs per tile
             + t_idx * _u32(0x85EBCA77)
             + c_idx * _u32(0x27D4EB2F))
        x = x ^ (x >> 16)
        x = x * _u32(0x7FEB352D)
        x = x ^ (x >> 15)
        x = x * _u32(0x846CA68B)
        x = x ^ (x >> 16)
        thresh = _u32(min(int(keep_prob * 4294967296.0), 4294967295))
        cat = jnp.where(x < thresh, cat * (1.0 / keep_prob), 0.0)
    out_ref[...] = cat                                    # single 128-lane store


def concat_pad_dropout(seed, mean3, ent3, rel3, valid3, keep_prob, *, out_pad=128):
    S, T, H = mean3.shape
    assert out_pad >= 3 * H
    return pl.pallas_call(
        functools.partial(_concat_dropout_kernel, h_dim=H,
                          keep_prob=float(keep_prob)),
        out_shape=jax.ShapeDtypeStruct((S, T, out_pad), jnp.float32),
        grid_spec=pltpu.PrefetchScalarGridSpec(
            num_scalar_prefetch=1,                        # dropout seed -> SMEM
            grid=(S,),
            in_specs=[
                pl.BlockSpec((1, T, H), lambda s, sd: (s, 0, 0)),   # mean
                pl.BlockSpec((1, 1, H), lambda s, sd: (s, 0, 0)),   # ent (no repeat)
                pl.BlockSpec((1, 1, H), lambda s, sd: (s, 0, 0)),   # rel (no repeat)
                pl.BlockSpec((1, T, 1), lambda s, sd: (s, 0, 0)),   # validity
            ],
            out_specs=pl.BlockSpec((1, T, out_pad), lambda s, sd: (s, 0, 0)),
        ),
        compiler_params=pltpu.CompilerParams(
            dimension_semantics=("parallel",),
            vmem_limit_bytes=32 * 1024 * 1024),
    )(seed, mean3, ent3, rel3, valid3)


# ------------------------------- main ----------------------------------------
if __name__ == "__main__":
    h_dim = 32
    seq_len = 10
    num_ents = 20
    num_rels = 6
    num_seqs = 4
    dropout_p = 0.2
    keep_prob = 1.0 - dropout_p
    use_gcn = True
    H_PAD = 128                      # lane-dense padded hidden size

    # ---- synthesize what get_sorted_s_r_embed would return (deterministic) ----
    s_len_non_zero = np.array([5, 4, 3, 2], dtype=np.int32)   # sorted descending
    G = int(s_len_non_zero.sum())                             # total history groups
    rng = np.random.RandomState(0)
    len_s = rng.randint(1, 5, size=G).astype(np.int32)        # neighbors per group
    N = int(len_s.sum())
    neighbor_ids = rng.randint(0, num_ents, size=N).astype(np.int32)
    s_tem = rng.randint(0, num_ents, size=num_seqs).astype(np.int32)
    r_tem = rng.randint(0, num_rels, size=num_seqs).astype(np.int32)

    key = jax.random.PRNGKey(0)
    k1, k2, k3, k4 = jax.random.split(key, 4)
    ent_embeds = jax.random.normal(k1, (num_ents, h_dim), dtype=jnp.float32)
    rel_embeds = jax.random.normal(k2, (num_rels, h_dim), dtype=jnp.float32)
    gcn_w = jax.random.normal(k3, (h_dim, h_dim), dtype=jnp.float32) * 0.1
    gcn_b = jax.random.normal(k4, (1, h_dim), dtype=jnp.float32) * 0.1

    # adaptive tiles (bigger on real workloads; shrink to data here)
    tg = min(256, _round_up(G, 16))
    tn = min(512, _round_up(N, 128))
    G_pad, N_pad = _round_up(G, tg), _round_up(N, tn)

    # dense 0/1 mask built DIRECTLY at padded size on the host (no device pad
    # pass); identical semantics to the torch.sparse mask_tensor.
    rows = np.repeat(np.arange(G), len_s)
    cols = np.arange(N)
    mask_np = np.zeros((G_pad, N_pad), dtype=np.float32)
    mask_np[rows, cols] = 1.0
    mask_p = jnp.asarray(mask_np, dtype=jnp.bfloat16)

    embeds_stack = ent_embeds[jnp.asarray(neighbor_ids)]      # glue gather (N, h)
    emb_p = jnp.zeros((N_pad, H_PAD), jnp.bfloat16).at[:N, :h_dim].set(
        embeds_stack.astype(jnp.bfloat16))

    len_f = len_s.astype(np.float32)
    inv_np = np.ones((G_pad, 1), np.float32)
    inv_np[:G, 0] = np.where(len_f > 0, 1.0 / np.maximum(len_f, 1.0), 0.0)
    inv_p = jnp.asarray(inv_np)                               # guarded: no inf

    w_p = jnp.zeros((H_PAD, H_PAD), jnp.bfloat16).at[:h_dim, :h_dim].set(
        gcn_w.astype(jnp.bfloat16))
    b_p = jnp.zeros((1, H_PAD), jnp.float32).at[:, :h_dim].set(gcn_b)

    k_ranges = jnp.asarray(compute_k_ranges(len_s, G, G_pad, tg, tn))

    # --- Pallas kernel 1: banded segment mean (+ GCN linear + relu) ---
    embeds_mean_pad = mean_aggregate(mask_p, emb_p, inv_p, k_ranges,
                                     w_p, b_p, use_gcn, tg=tg, tn=tn)

    # --- glue: per-(seq, t) group index + validity (the torch.split loop) ---
    group_offsets = np.concatenate([[0], np.cumsum(s_len_non_zero)[:-1]])
    group_idx = np.zeros((num_seqs, seq_len), dtype=np.int32)
    valid_np = np.zeros((num_seqs, seq_len, 1), dtype=np.float32)
    for i in range(num_seqs):
        L = int(s_len_non_zero[i])
        group_idx[i, :L] = group_offsets[i] + np.arange(L)
        valid_np[i, :L, 0] = 1.0

    mean3 = embeds_mean_pad[jnp.asarray(group_idx)][..., :h_dim]   # (S, T, h)
    ent3 = ent_embeds[jnp.asarray(s_tem)][:, None, :]              # (S, 1, h)
    rel3 = rel_embeds[jnp.asarray(r_tem)][:, None, :]              # (S, 1, h)
    valid3 = jnp.asarray(valid_np)                                 # (S, T, 1)
    seed = jnp.asarray([12345], dtype=jnp.int32)                   # dropout seed

    # --- Pallas kernel 2: concat + padding mask + hash dropout (lane-dense) ---
    out_pad = concat_pad_dropout(seed, mean3, ent3, rel3, valid3, keep_prob,
                                 out_pad=H_PAD)                    # (S, T, 128)
    s_embed_seq_tensor = out_pad[..., :3 * h_dim]                  # (S, T, 3*h)

    # pack_padded_sequence(batch_first=True): pure data rearrangement in glue
    max_len = int(s_len_non_zero.max())
    batch_sizes = np.array([(s_len_non_zero > t).sum() for t in range(max_len)],
                           dtype=np.int32)
    packed_data = jnp.concatenate(
        [s_embed_seq_tensor[: int(b), t, :] for t, b in enumerate(batch_sizes)],
        axis=0)

    # ---------------- correctness checks vs f32 JAX reference ----------------
    mask_real = jnp.asarray(mask_np[:G, :N])
    inv_real = jnp.asarray(inv_np[:G])
    mean_ref = (mask_real @ embeds_stack) * inv_real
    if use_gcn:
        mean_ref = jnp.maximum(mean_ref @ gcn_w + gcn_b, 0.0)
    assert jnp.allclose(embeds_mean_pad[:G, :h_dim], mean_ref,
                        atol=8e-2, rtol=8e-2), "kernel-1 mismatch"

    cat_ref = jnp.concatenate(
        [mean_ref[jnp.asarray(group_idx)],
         jnp.broadcast_to(ent_embeds[jnp.asarray(s_tem)][:, None, :],
                          (num_seqs, seq_len, h_dim)),
         jnp.broadcast_to(rel_embeds[jnp.asarray(r_tem)][:, None, :],
                          (num_seqs, seq_len, h_dim))], axis=-1) * valid3
    # every element is either dropped (==0) or kept (== ref / keep_prob)
    err = jnp.minimum(jnp.abs(s_embed_seq_tensor),
                      jnp.abs(s_embed_seq_tensor - cat_ref / keep_prob))
    assert float(err.max()) < 1e-1, "kernel-2 mismatch"

    assert s_embed_seq_tensor.shape == (num_seqs, seq_len, 3 * h_dim)
    assert packed_data.shape == (int(batch_sizes.sum()), 3 * h_dim)

    jax.block_until_ready(s_embed_seq_tensor)
    jax.block_until_ready(packed_data)
    print("KERNEL_OK")
</pallas_src>

<mosaic_0001>
module attributes {stable_mosaic.version = 11 : i64} {
  func.func @_mean_gcn_kernel(%arg0: i32, %arg1: i32, %arg2: memref<1x2xi32, #tpu.memory_space<smem>>, %arg3: memref<16x128xbf16, #tpu.memory_space<vmem>>, %arg4: memref<128x128xbf16, #tpu.memory_space<vmem>>, %arg5: memref<16x1xf32, #tpu.memory_space<vmem>>, %arg6: memref<128x128xbf16, #tpu.memory_space<vmem>>, %arg7: memref<1x128xf32, #tpu.memory_space<vmem>>, %arg8: memref<16x128xf32, #tpu.memory_space<vmem>>, %arg9: memref<16x128xf32, #tpu.memory_space<vmem>>) attributes {dimension_semantics = [#tpu.dimension_semantics<parallel>, #tpu.dimension_semantics<arbitrary>], iteration_bounds = array<i64: 1, 1>, scalar_prefetch = 1 : i64, scratch_operands = 1 : i64, tpu.core_type = #tpu.core_type<tc>, window_params = [{transform_indices = @transform_0, window_bounds = array<i64: 16, 128>}, {transform_indices = @transform_1, window_bounds = array<i64: 128, 128>}, {transform_indices = @transform_2, window_bounds = array<i64: 16, 1>}, {pipeline_mode = #tpu.pipeline_mode<synchronous>, transform_indices = @transform_3, window_bounds = array<i64: 128, 128>}, {pipeline_mode = #tpu.pipeline_mode<synchronous>, transform_indices = @transform_4, window_bounds = array<i64: 1, 128>}, {transform_indices = @transform_5, window_bounds = array<i64: 16, 128>}]} {
    %c0_i32 = arith.constant 0 : i32
    %0 = arith.cmpi eq, %arg1, %c0_i32 : i32
    %1 = arith.extui %0 : i1 to i32
    %c0_i32_0 = arith.constant 0 : i32
    %2 = arith.cmpi ne, %1, %c0_i32_0 : i32
    scf.if %2 {
      %cst = arith.constant 0.000000e+00 : f32
      %15 = vector.broadcast %cst : f32 to vector<16x128xf32>
      %c0_4 = arith.constant 0 : index
      %c0_5 = arith.constant 0 : index
      %16 = vector.load %arg9[%c0_4, %c0_5] : memref<16x128xf32, #tpu.memory_space<vmem>>, vector<16x128xf32>
      tpu.vector_store %arg9[%c0_4, %c0_5], %15 {strides = array<i32>} : memref<16x128xf32, #tpu.memory_space<vmem>>, vector<16x128xf32>,
    } else {
    }
    %3 = arith.index_cast %arg0 : i32 to index
    %c0 = arith.constant 0 : index
    %4 = memref.load %arg2[%3, %c0] : memref<1x2xi32, #tpu.memory_space<smem>>
    %5 = arith.index_cast %arg0 : i32 to index
    %c1 = arith.constant 1 : index
    %6 = memref.load %arg2[%5, %c1] : memref<1x2xi32, #tpu.memory_space<smem>>
    %7 = arith.cmpi sge, %arg1, %4 : i32
    %8 = arith.cmpi sle, %arg1, %6 : i32
    %9 = arith.andi %7, %8 : i1
    %10 = arith.extui %9 : i1 to i32
    %c0_i32_1 = arith.constant 0 : i32
    %11 = arith.cmpi ne, %10, %c0_i32_1 : i32
    scf.if %11 {
      %c0_4 = arith.constant 0 : index
      %c0_5 = arith.constant 0 : index
      %15 = vector.load %arg9[%c0_4, %c0_5] : memref<16x128xf32, #tpu.memory_space<vmem>>, vector<16x128xf32>
      %c0_6 = arith.constant 0 : index
      %c0_7 = arith.constant 0 : index
      %16 = vector.load %arg3[%c0_6, %c0_7] : memref<16x128xbf16, #tpu.memory_space<vmem>>, vector<16x128xbf16>
      %c0_8 = arith.constant 0 : index
      %c0_9 = arith.constant 0 : index
      %17 = vector.load %arg4[%c0_8, %c0_9] : memref<128x128xbf16, #tpu.memory_space<vmem>>, vector<128x128xbf16>
      %cst = arith.constant dense<0.000000e+00> : vector<16x128xf32>
      %18 = tpu.matmul %16, %17, %cst {dimension_numbers = #tpu.dot_dimension_numbers<[1], [0], [0], [1], [0, 0, 1, 1], [], []>} : vector<16x128xbf16>, vector<128x128xbf16>, vector<16x128xf32> -> vector<16x128xf32>
      %19 = arith.addf %15, %18 : vector<16x128xf32>
      %c0_10 = arith.constant 0 : index
      %c0_11 = arith.constant 0 : index
      %20 = vector.load %arg9[%c0_10, %c0_11] : memref<16x128xf32, #tpu.memory_space<vmem>>, vector<16x128xf32>
      tpu.vector_store %arg9[%c0_10, %c0_11], %19 {strides = array<i32>} : memref<16x128xf32, #tpu.memory_space<vmem>>, vector<16x128xf32>,
    } else {
    }
    %c0_i32_2 = arith.constant 0 : i32
    %12 = arith.cmpi eq, %arg1, %c0_i32_2 : i32
    %13 = arith.extui %12 : i1 to i32
    %c0_i32_3 = arith.constant 0 : i32
    %14 = arith.cmpi ne, %13, %c0_i32_3 : i32
    scf.if %14 {
      %c0_4 = arith.constant 0 : index
      %c0_5 = arith.constant 0 : index
      %15 = vector.load %arg9[%c0_4, %c0_5] : memref<16x128xf32, #tpu.memory_space<vmem>>, vector<16x128xf32>
      %c0_6 = arith.constant 0 : index
      %c0_7 = arith.constant 0 : index
      %16 = vector.load %arg5[%c0_6, %c0_7] : memref<16x1xf32, #tpu.memory_space<vmem>>, vector<16x1xf32>
      %17 = vector.broadcast %16 : vector<16x1xf32> to vector<16x128xf32>
      %18 = arith.mulf %15, %17 : vector<16x128xf32>
      %19 = arith.truncf %18 : vector<16x128xf32> to vector<16x128xbf16>
      %c0_8 = arith.constant 0 : index
      %c0_9 = arith.constant 0 : index
      %20 = vector.load %arg6[%c0_8, %c0_9] : memref<128x128xbf16, #tpu.memory_space<vmem>>, vector<128x128xbf16>
      %cst = arith.constant dense<0.000000e+00> : vector<16x128xf32>
      %21 = tpu.matmul %19, %20, %cst {dimension_numbers = #tpu.dot_dimension_numbers<[1], [0], [0], [1], [0, 0, 1, 1], [], []>} : vector<16x128xbf16>, vector<128x128xbf16>, vector<16x128xf32> -> vector<16x128xf32>
      %c0_10 = arith.constant 0 : index
      %c0_11 = arith.constant 0 : index
      %22 = vector.load %arg7[%c0_10, %c0_11] : memref<1x128xf32, #tpu.memory_space<vmem>>, vector<1x128xf32>
      %23 = vector.broadcast %22 : vector<1x128xf32> to vector<16x128xf32>
      %24 = arith.addf %21, %23 : vector<16x128xf32>
      %cst_12 = arith.constant 0.000000e+00 : f32
      %25 = vector.broadcast %cst_12 : f32 to vector<16x128xf32>
      %26 = arith.maximumf %24, %25 : vector<16x128xf32>
      %c0_13 = arith.constant 0 : index
      %c0_14 = arith.constant 0 : index
      %27 = vector.load %arg8[%c0_13, %c0_14] : memref<16x128xf32, #tpu.memory_space<vmem>>, vector<16x128xf32>
      tpu.vector_store %arg8[%c0_13, %c0_14], %26 {strides = array<i32>} : memref<16x128xf32, #tpu.memory_space<vmem>>, vector<16x128xf32>,
    } else {
    }
    return
  }
  func.func @transform_0(%arg0: i32, %arg1: i32, %arg2: memref<1x2xi32, #tpu.memory_space<smem>>) -> (i32, i32) {
    %0 = arith.index_cast %arg0 : i32 to index
    %c0 = arith.constant 0 : index
    %1 = memref.load %arg2[%0, %c0] : memref<1x2xi32, #tpu.memory_space<smem>>
    %2 = arith.index_cast %arg0 : i32 to index
    %c1 = arith.constant 1 : index
    %3 = memref.load %arg2[%2, %c1] : memref<1x2xi32, #tpu.memory_space<smem>>
    %4 = arith.maxsi %arg1, %1 : i32
    %5 = arith.minsi %4, %3 : i32
    %c0_i32 = arith.constant 0 : i32
    return %arg0, %5 : i32, i32
  }
  func.func @transform_1(%arg0: i32, %arg1: i32, %arg2: memref<1x2xi32, #tpu.memory_space<smem>>) -> (i32, i32) {
    %0 = arith.index_cast %arg0 : i32 to index
    %c0 = arith.constant 0 : index
    %1 = memref.load %arg2[%0, %c0] : memref<1x2xi32, #tpu.memory_space<smem>>
    %2 = arith.index_cast %arg0 : i32 to index
    %c1 = arith.constant 1 : index
    %3 = memref.load %arg2[%2, %c1] : memref<1x2xi32, #tpu.memory_space<smem>>
    %4 = arith.maxsi %arg1, %1 : i32
    %5 = arith.minsi %4, %3 : i32
    %c0_i32 = arith.constant 0 : i32
    %c0_i32_0 = arith.constant 0 : i32
    return %5, %c0_i32 : i32, i32
  }
  func.func @transform_2(%arg0: i32, %arg1: i32, %arg2: memref<1x2xi32, #tpu.memory_space<smem>>) -> (i32, i32) {
    %c0_i32 = arith.constant 0 : i32
    %c0_i32_0 = arith.constant 0 : i32
    return %arg0, %c0_i32 : i32, i32
  }
  func.func @transform_3(%arg0: i32, %arg1: i32, %arg2: memref<1x2xi32, #tpu.memory_space<smem>>) -> (i32, i32) {
    %c0_i32 = arith.constant 0 : i32
    %c0_i32_0 = arith.constant 0 : i32
    %c0_i32_1 = arith.constant 0 : i32
    return %c0_i32, %c0_i32_0 : i32, i32
  }
  func.func @transform_4(%arg0: i32, %arg1: i32, %arg2: memref<1x2xi32, #tpu.memory_space<smem>>) -> (i32, i32) {
    %c0_i32 = arith.constant 0 : i32
    %c0_i32_0 = arith.constant 0 : i32
    %c0_i32_1 = arith.constant 0 : i32
    return %c0_i32, %c0_i32_0 : i32, i32
  }
  func.func @transform_5(%arg0: i32, %arg1: i32, %arg2: memref<1x2xi32, #tpu.memory_space<smem>>) -> (i32, i32) {
    %c0_i32 = arith.constant 0 : i32
    %c0_i32_0 = arith.constant 0 : i32
    return %arg0, %c0_i32 : i32, i32
  }
}

</mosaic_0001>

<bundles_post_ra>
// kernel: tpu_custom_call.1
= control target key start
LH: loop header
LB: loop body
LE: loop exit
PB: predicated region body
PF: predicated region fallthrough
CT: control target
= control target key end

     0   :  { %s892_s0 = inlined_call_operand.hbm [shape: s32[1,2], index: 0, kind: input, shape index: {}]   ;;  %s893_s1 = inlined_call_operand.hbm [shape: bf16[16,128], index: 1, kind: input, shape index: {}]   ;;  %s894_s2 = inlined_call_operand.hbm [shape: bf16[128,128], index: 2, kind: input, shape index: {}]   ;;  %s895_s3 = inlined_call_operand.hbm [shape: f32[16,1], index: 3, kind: input, shape index: {}]   ;;  %s896_s4 = inlined_call_operand.hbm [shape: bf16[128,128], index: 4, kind: input, shape index: {}]   ;;  %s897_s5 = inlined_call_operand.hbm [shape: f32[1,128], index: 5, kind: input, shape index: {}]   ;;  %s898_s6 = inlined_call_operand.hbm [shape: f32[16,128], index: 6, kind: output, shape index: {}]  }
   0x1   :  { %s546_s23 = scalar_lea.hbm %s892_s0, 16 }
   0x2   :  { %p547_p0 = scmp.ne.s32.totalorder %s892_s0, %s546_s23  ;;  %p550_p1 = scmp.lt.u32.totalorder %s546_s23, %s892_s0 }
   0x4   :  { %p552_p2 = pnand %p550_p1, %p547_p0 }
   0x6   :  { %555 = shalt.err (!%p552_p2)  }
   0x7   :  { %s702_s28 = smov [#allocation4]  }
   0x8   :  { %12 = dma.hbm_to_smem %s892_s0, 16, %s702_s28, [#allocation3] }
   0x9   :  { %692 = dma.done.wait [#allocation3], 16 }
   0xa   :  { %693 = vsyncadd [#allocation3], 4294967280 }
   0xb   :  { %14 = sfence }
   0xc   :  { %15 = vsyncpa [#allocation6], 0 }
   0xd   :  { %16 = vsyncpa [#allocation9], 0 }
   0xe   :  { %17 = vsyncpa [#allocation12], 0 }
   0xf   :  { %18 = vsyncpa [#allocation7], 0  ;;  %s44_s7 = sld [smem:[#allocation4]]  ;;  %s765_s8 = sld [smem:[#allocation4 + $0x1]] }
  0x10   :  { %s703_s9 = smov [#allocation11]   ;;  %s704_s11 = smov [#allocation8]  }
  0x11   :  { %s81_s10 = sshll.u32 %s703_s9, 4  ;;  %s57_s12 = sshll.u32 %s704_s11, 4  ;;  %s82_s10 = int_to_ptr.vmem [resolvable:$true] %s81_s10  ;;  %s782_s12 = int_to_ptr.vmem [resolvable:$true] %s57_s12 }
  0x12   :  { %s556_s15 = scalar_lea.hbm %s896_s4, 1024 }
  0x13   :  { %p557_p3 = scmp.ne.s32.totalorder %s896_s4, %s556_s15  ;;  %p560_p4 = scmp.lt.u32.totalorder %s556_s15, %s896_s4 }
  0x15   :  { %p562_p5 = pnand %p560_p4, %p557_p3 }
  0x17   :  { %565 = shalt.err (!%p562_p5)
}
  0x18   :  { %s566_s19 = scalar_lea.vmem %s82_s10, 1024  ;;  %p571_p7 = scmp.lt.s32.totalorder %s82_s10, %s82_s10 }
  0x19   :  { %p567_p6 = scmp.ne.s32.totalorder %s82_s10, %s566_s19  ;;  %p572_p8 = scmp.lt.s32.totalorder %s566_s19, %s566_s19 }
  0x1b   :  { %p573_p9 = por %p572_p8, %p571_p7 }
  0x1d   :  { %p574_p10 = pnand %p573_p9, %p567_p6 }
  0x1f   :  { %577 = shalt.err (!%p574_p10)
}
  0x20   :  { %s705_s20 = smov 64   ;;  %s706_s21 = smov 4  }
  0x21   :  { %87 = dma.hbm_to_vmem [thread:$0]  %s896_s4, 1024, %s82_s10, [#allocation12], %s705_s20, %s705_s20, %s706_s21  }
  0x22   :  { %p429_p11 = scmp.lt.s32.totalorder %s44_s7, 0  ;;  %s707_s24 = smov [#allocation5]  }
  0x23   :  { %s34_s25 = sshll.u32 %s707_s24, 4  ;;  %s708_s26 = smov [#allocation10]   ;;  %s784_s25 = int_to_ptr.vmem [resolvable:$true] %s34_s25 }
  0x24   :  { %s69_s27 = sshll.u32 %s708_s26, 4  ;;  %s900_s7 = smov (%p429_p11, %s44_s7), 0  ;;  %s787_s27 = int_to_ptr.vmem [resolvable:$true] %s69_s27 }
  0x25   :  { %p49_p12 = scmp.lt.s32.totalorder %s900_s7, %s765_s8  ;;  %s709_s28 = smov [#allocation13]  }
  0x26   :  { %s790_s29 = sshll.u32 %s709_s28, 4  ;;  %s95_s29 = int_to_ptr.vmem [resolvable:$true] %s790_s29 }
  0x27   :  { %s902_s7 = smov (!%p49_p12, %s900_s7), %s765_s8  ;;  %s580_s8 = scalar_lea.hbm %s894_s2, 1024 }
  0x28   :  { %s453_s30 = sshll.u32 %s902_s7, 10  ;;  %s427_s9 = sshll.u32 %s902_s7, 6 }
  0x29   :  { %s56_s11 = scalar_lea.hbm %s894_s2, %s453_s30  ;;  %s798_s15 = scalar_lea.hbm %s893_s1, %s427_s9 }
  0x2a   :  { %s578_s0 = scalar_lea.hbm %s56_s11, 1024  ;;  %p581_p0 = scmp.lt.u32.totalorder %s56_s11, %s894_s2 }
  0x2b   :  { %p579_p13 = scmp.ne.s32.totalorder %s56_s11, %s578_s0  ;;  %p582_p1 = scmp.lt.u32.totalorder %s580_s8, %s578_s0 }
  0x2c   :  { %p584_p3 = scmp.lt.u32.totalorder %s578_s0, %s56_s11 }
  0x2d   :  { %p583_p2 = por %p582_p1, %p581_p0 }
  0x2f   :  { %p585_p4 = por %p584_p3, %p583_p2 }
  0x31   :  { %p586_p5 = pnand %p585_p4, %p579_p13 }
  0x33   :  { %589 = shalt.err (!%p586_p5)
}
  0x34   :  { %s590_s7 = scalar_lea.vmem %s782_s12, 1024  ;;  %p595_p7 = scmp.lt.s32.totalorder %s782_s12, %s782_s12 }
  0x35   :  { %p591_p6 = scmp.ne.s32.totalorder %s782_s12, %s590_s7  ;;  %p596_p8 = scmp.lt.s32.totalorder %s590_s7, %s590_s7 }
  0x37   :  { %p597_p9 = por %p596_p8, %p595_p7 }
  0x39   :  { %p598_p10 = pnand %p597_p9, %p591_p6 }
  0x3b   :  { %601 = shalt.err (!%p598_p10)
}
  0x3c   :  { %63 = dma.hbm_to_vmem [thread:$0]  %s56_s11, 1024, %s782_s12, [#allocation9], %s705_s20, %s705_s20, %s706_s21  }
  0x3d   :  { %s602_s2 = scalar_lea.hbm %s798_s15, 128  ;;  %s604_s24 = scalar_lea.hbm %s893_s1, 128 }
  0x3e   :  { %p603_p11 = scmp.ne.s32.totalorder %s798_s15, %s602_s2  ;;  %p605_p12 = scmp.lt.u32.totalorder %s798_s15, %s893_s1 }
  0x3f   :  { %p606_p13 = scmp.lt.u32.totalorder %s604_s24, %s602_s2  ;;  %p608_p1 = scmp.lt.u32.totalorder %s602_s2, %s798_s15 }
  0x41   :  { %p607_p0 = por %p606_p13, %p605_p12 }
  0x43   :  { %p609_p2 = por %p608_p1, %p607_p0 }
  0x45   :  { %p610_p3 = pnand %p609_p2, %p603_p11 }
  0x47   :  { %613 = shalt.err (!%p610_p3)
}
  0x48   :  { %s614_s12 = scalar_lea.vmem %s784_s25, 128  ;;  %p619_p5 = scmp.lt.s32.totalorder %s784_s25, %s784_s25 }
  0x49   :  { %p615_p4 = scmp.ne.s32.totalorder %s784_s25, %s614_s12  ;;  %p620_p6 = scmp.lt.s32.totalorder %s614_s12, %s614_s12 }
  0x4b   :  { %p621_p7 = por %p620_p6, %p619_p5 }
  0x4d   :  { %p622_p8 = pnand %p621_p7, %p615_p4 }
  0x4f   :  { %625 = shalt.err (!%p622_p8)
}
  0x50   :  { %40 = dma.hbm_to_vmem [thread:$0]  %s798_s15, 128, %s784_s25, [#allocation6], %s705_s20, %s705_s20, %s706_s21  }
  0x51   :  { %s626_s9 = scalar_lea.hbm %s895_s3, 256 }
  0x52   :  { %p627_p9 = scmp.ne.s32.totalorder %s895_s3, %s626_s9  ;;  %p630_p10 = scmp.lt.u32.totalorder %s626_s9, %s895_s3 }
  0x54   :  { %p632_p11 = pnand %p630_p10, %p627_p9 }
  0x56   :  { %635 = shalt.err (!%p632_p11)
}
  0x57   :  { %s636_s14 = scalar_lea.vmem %s787_s27, 256  ;;  %p641_p13 = scmp.lt.s32.totalorder %s787_s27, %s787_s27 }
  0x58   :  { %p637_p12 = scmp.ne.s32.totalorder %s787_s27, %s636_s14  ;;  %p642_p0 = scmp.lt.s32.totalorder %s636_s14, %s636_s14 }
  0x5a   :  { %p643_p1 = por %p642_p0, %p641_p13 }
  0x5c   :  { %p644_p2 = pnand %p643_p1, %p637_p12 }
  0x5e   :  { %647 = shalt.err (!%p644_p2)
}
  0x5f   :  { %s710_s20 = smov 128   ;;  %s711_s21 = smov 8  }
  0x60   :  { %75 = dma.hbm_to_vmem [thread:$0]  %s895_s3, 256, %s787_s27, [#allocation9], %s710_s20, %s710_s20, %s711_s21  }
  0x61   :  { %s648_s17 = scalar_lea.hbm %s897_s5, 16 }
  0x62   :  { %p649_p3 = scmp.ne.s32.totalorder %s897_s5, %s648_s17  ;;  %p652_p4 = scmp.lt.u32.totalorder %s648_s17, %s897_s5 }
  0x64   :  { %p654_p5 = pnand %p652_p4, %p649_p3 }
  0x66   :  { %657 = shalt.err (!%p654_p5)
}
  0x67   :  { %s658_s2 = scalar_lea.vmem %s95_s29, 16  ;;  %s662_s22 = scalar_lea.vmem %s95_s29, 32 }
  0x68   :  { %p659_p6 = scmp.ne.s32.totalorder %s95_s29, %s658_s2  ;;  %p663_p7 = scmp.lt.s32.totalorder %s95_s29, %s95_s29 }
  0x69   :  { %p664_p8 = scmp.lt.s32.totalorder %s662_s22, %s658_s2 }
  0x6b   :  { %p665_p9 = por %p664_p8, %p663_p7 }
  0x6d   :  { %p666_p10 = pnand %p665_p9, %p659_p6 }
  0x6f   :  { %669 = shalt.err (!%p666_p10)
}
  0x70   :  { %97 = dma.hbm_to_vmem [thread:$0]  %s897_s5, 16, %s95_s29, [#allocation12]  }
  0x71   :  { %694 = dma.done.wait [#allocation6], 128  }
  0x72   :  { %695 = vsyncadd [#allocation6], 4294967168 }
  0x73   :  { %696 = dma.done.wait [#allocation9], 1280  }
  0x74   :  { %697 = vsyncadd [#allocation9], 4294966016 }
  0x75   :  { %698 = dma.done.wait [#allocation12], 1040  }
  0x76   :  { %699 = vsyncadd [#allocation12], 4294966256  ;;  %s138_s23 = sld [smem:[#allocation4]]  ;;  %s432_s24 = sld [smem:[#allocation4 + $0x1]]  ;;  %v712_v0 = vmov 0.0  }
  0x77   :  { %135 = vst [vmem:[#allocation2] sm:$0xff] %v712_v0  ;;  %136 = vst [vmem:[#allocation2 + $0x8] sm:$0xff] %v712_v0 }
  0x7c   :  { %p433_p11 = scmp.le.s32.totalorder %s138_s23, 0  ;;  %p434_p12 = scmp.ge.s32.totalorder %s432_s24, 0 }
  0x7e   :  { %p143_p13 = pnand %p434_p12, %p433_p11 }
  0x7f   :  { %v528_v1 = vld [vmem:[#allocation8] sm:$0xff] (!%p143_p13)   ;;  %v713_v2 = vmov (!%p143_p13), 0.0   ;;  %v529_v3 = vld [vmem:[#allocation8 + $0x8] sm:$0xff] (!%p143_p13)   ;;  %vm714_vm0 = vmmov (!%p143_p13), 0   ;;  %v530_v4 = vld [vmem:[#allocation8 + $0x10] sm:$0xff] (!%p143_p13)  }
  0x80   :  { %146 = sbr.rel (%p143_p13) target bundleno = 377 (0x179), region = 49  ;;  %472 = vmatprep.subr.bf16.mxu0 (!%p143_p13), %v713_v2  ;;  %488 = vmatprep.mubr.msk.bf16.mxu0 (!%p143_p13), %vm714_vm0, %v713_v2  ;;  %v531_v5 = vld [vmem:[#allocation8 + $0x18] sm:$0xff] (!%p143_p13)   ;;  %v532_v6 = vld [vmem:[#allocation8 + $0x20] sm:$0xff] (!%p143_p13)   ;;  %v533_v7 = vld [vmem:[#allocation8 + $0x28] sm:$0xff] (!%p143_p13)  }
  0x81   :  { %473 = vmatpush3.bf16.msra.mxu0 (!%p143_p13), %v528_v1  ;;  %v534_v8 = vld [vmem:[#allocation8 + $0x30] sm:$0xff] (!%p143_p13)   ;;  %v535_v9 = vld [vmem:[#allocation8 + $0x38] sm:$0xff] (!%p143_p13)   ;;  %v147_v11 = vld [vmem:[#allocation2] sm:$0xff] (!%p143_p13) }
  0x82   :  { %474 = vmatprep.subr.bf16.mxu0 (!%p143_p13), %v713_v2  ;;  %v536_v10 = vld [vmem:[#allocation5] sm:$0xff] (!%p143_p13)   ;;  %v148_v13 = vld [vmem:[#allocation2 + $0x8] sm:$0xff] (!%p143_p13) }
  0x85   :  { %475 = vmatpush3.bf16.msra.mxu0 (!%p143_p13), %v529_v3 }
  0x86   :  { %476 = vmatprep.subr.bf16.mxu0 (!%p143_p13), %v713_v2 }
  0x89   :  { %477 = vmatpush3.bf16.msra.mxu0 %v530_v4 }
  0x8a   :  { %478 = vmatprep.subr.bf16.mxu0 %v713_v2 }
  0x8d   :  { %479 = vmatpush3.bf16.msra.mxu0 %v531_v5 }
  0x8e   :  { %480 = vmatprep.subr.bf16.mxu0 %v713_v2 }
  0x91   :  { %481 = vmatpush3.bf16.msra.mxu0 %v532_v6 }
  0x92   :  { %482 = vmatprep.subr.bf16.mxu0 %v713_v2 }
  0x95   :  { %483 = vmatpush3.bf16.msra.mxu0 %v533_v7 }
  0x96   :  { %484 = vmatprep.subr.bf16.mxu0 %v713_v2 }
  0x99   :  { %485 = vmatpush3.bf16.msra.mxu0 %v534_v8 }
  0x9a   :  { %486 = vmatprep.subr.bf16.mxu0 %v713_v2 }
  0x9d   :  { %487 = vmatpush3.bf16.msra.mxu0 %v535_v9 }
  0xa0   :  { %489 = vmatmul.mubr.bf16.vlgmr.msra.gmra.mrb[0].mxu0 %v536_v10 }
 0x173   :  { %v255_v12 = vpop.f32.mrb[0].mxu0 }
 0x174   :  { %v262_v14 = vadd.f32 %v255_v12, %v147_v11  ;;  %v490_v15 = vpop.f32.mrb[1].mxu0 }
 0x175   :  { %v258_v16 = vpop.f32.mrb[2].mxu0 }
 0x176   :  { %264 = vst [vmem:[#allocation2] sm:$0xff] %v262_v14  ;;  %v263_v17 = vadd.f32 %v258_v16, %v148_v13  ;;  %v491_v18 = vpop.f32.mrb[3].mxu0 }
 0x178   :  { %265 = vst [vmem:[#allocation2 + $0x8] sm:$0xff] %v263_v17 }
 0x179 PF:  { %v271_v19 = vld [vmem:[#allocation10] sm:$0xff]  ;;  %492 = vmatprep.subr.bf16.mxu0 %v712_v0  ;;  %v715_v20 = vmov 0   ;;  %v538_v21 = vld [vmem:[#allocation11] sm:$0xff]   ;;  %v272_v22 = vld [vmem:[#allocation10 + $0x8] sm:$0xff]  ;;  %vm716_vm1 = vmmov 0   ;;  %s717_s5 = smov [#allocation14]  }
 0x17a   :  { %537 = vset.pattern.permute.xlu0 %v715_v20  ;;  %493 = vmatpush3.bf16.msra.mxu0 %v538_v21  ;;  %v539_v23 = vld [vmem:[#allocation11 + $0x8] sm:$0xff]   ;;  %v540_v24 = vld [vmem:[#allocation11 + $0x10] sm:$0xff]   ;;  %v541_v25 = vld [vmem:[#allocation11 + $0x18] sm:$0xff]   ;;  %s407_s29 = sshll.u32 %s717_s5, 4  ;;  %s408_s29 = int_to_ptr.vmem [resolvable:$true] %s407_s29 }
 0x17b   :  { %275 = vperm.xlu0 %537, %v271_v19   ;;  %494 = vmatprep.subr.bf16.mxu0 %v712_v0  ;;  %v542_v26 = vld [vmem:[#allocation11 + $0x20] sm:$0xff]   ;;  %v543_v27 = vld [vmem:[#allocation11 + $0x28] sm:$0xff]   ;;  %v544_v28 = vld [vmem:[#allocation11 + $0x30] sm:$0xff]   ;;  %s670_s26 = scalar_lea.vmem %s408_s29, 256  ;;  %p675_p1 = scmp.lt.s32.totalorder %s408_s29, %s408_s29 }
 0x17c   :  { %508 = vmatprep.mubr.msk.bf16.mxu0 %vm716_vm1, %v712_v0  ;;  %v545_v29 = vld [vmem:[#allocation11 + $0x38] sm:$0xff]   ;;  %v444_v37 = vld [vmem:[#allocation13] ss:$0 sm:$0xff]  ;;  %p671_p0 = scmp.ne.s32.totalorder %s408_s29, %s670_s26  ;;  %p676_p2 = scmp.lt.s32.totalorder %s670_s26, %s670_s26 }
 0x17d   :  { %v269_v31 = vld [vmem:[#allocation2] sm:$0xff] }
 0x17e   :  { %495 = vmatpush3.bf16.msra.mxu0 %v539_v23  ;;  %p677_p3 = por %p676_p2, %p675_p1 }
 0x17f   :  { %280 = vperm.xlu0 %537, %v272_v22   ;;  %496 = vmatprep.subr.bf16.mxu0 %v712_v0  ;;  %v270_v32 = vld [vmem:[#allocation2 + $0x8] sm:$0xff] }
 0x180   :  { %p678_p4 = pnand %p677_p3, %p671_p0 }
 0x182   :  { %497 = vmatpush3.bf16.msra.mxu0 %v540_v24 }
 0x183   :  { %498 = vmatprep.subr.bf16.mxu0 %v712_v0 }
 0x186   :  { %499 = vmatpush3.bf16.msra.mxu0 %v541_v25 }
 0x187   :  { %500 = vmatprep.subr.bf16.mxu0 %v712_v0 }
 0x18a   :  { %501 = vmatpush3.bf16.msra.mxu0 %v542_v26 }
 0x18b   :  { %502 = vmatprep.subr.bf16.mxu0 %v712_v0 }
 0x18e   :  { %503 = vmatpush3.bf16.msra.mxu0 %v543_v27 }
 0x18f   :  { %504 = vmatprep.subr.bf16.mxu0 %v712_v0 }
 0x192   :  { %505 = vmatpush3.bf16.msra.mxu0 %v544_v28 }
 0x193   :  { %506 = vmatprep.subr.bf16.mxu0 %v712_v0 }
 0x196   :  { %507 = vmatpush3.bf16.msra.mxu0 %v545_v29 }
 0x1fa   :  { %v276_v30 = vpop.permute.xlu0 %275 }
 0x1fb   :  { %v283_v34 = vmul.f32 %v276_v30, %v269_v31 }
 0x1fe   :  { %v281_v33 = vpop.permute.xlu0 %280 }
 0x1ff   :  { %v284_v35 = vmul.f32 %v281_v33, %v270_v32 }
 0x201   :  { %v285_v36 = vpack.c.bf16 %v284_v35, %v283_v34 }
 0x203   :  { %509 = vmatmul.mubr.bf16.vlgmr.msra.gmra.mrb[0].mxu0 %v285_v36 }
 0x2d6   :  { %v391_v38 = vpop.f32.mrb[0].mxu0 }
 0x2d7   :  { %v392_v39 = vadd.f32 %v444_v37, %v391_v38  ;;  %v510_v40 = vpop.f32.mrb[1].mxu0 }
 0x2d8   :  { %v394_v41 = vpop.f32.mrb[2].mxu0 }
 0x2d9   :  { %v398_v42 = vmax.f32 %v392_v39, 0.0  ;;  %v395_v43 = vadd.f32 %v444_v37, %v394_v41  ;;  %v511_v44 = vpop.f32.mrb[3].mxu0 }
 0x2db   :  { %400 = vst [vmem:[#allocation14] sm:$0xff] %v398_v42  ;;  %v399_v45 = vmax.f32 %v395_v43, 0.0 }
 0x2dd   :  { %401 = vst [vmem:[#allocation14 + $0x8] sm:$0xff] %v399_v45 }
 0x2de   :  { %681 = shalt.err (!%p678_p4)
}
 0x2df   :  { %s682_s1 = scalar_lea.hbm %s898_s6, 256 }
 0x2e0   :  { %p683_p5 = scmp.ne.s32.totalorder %s898_s6, %s682_s1  ;;  %p686_p6 = scmp.lt.u32.totalorder %s682_s1, %s898_s6 }
 0x2e2   :  { %p688_p7 = pnand %p686_p6, %p683_p5 }
 0x2e4   :  { %691 = shalt.err (!%p688_p7)
}
 0x2e5   :  { %413 = dma.vmem_to_hbm [thread:$0]  %s408_s29, 256, %s898_s6, [#allocation7], %s710_s20, %s710_s20, %s711_s21  }
 0x2e6   :  { %700 = dma.done.wait [#allocation7], 256  }
 0x2e7   :  { %701 = vsyncadd [#allocation7], 4294967040 }
 0x2e8   :  { %417 = vsyncpa [#allocation6], 1 }
 0x2e9   :  { %418 = vsyncpa [#allocation9], 1 }
 0x2ea   :  { %419 = vsyncpa [#allocation12], 1 }
 0x2eb   :  { %420 = vsyncpa [#allocation7], 1 }

</bundles_post_ra>
